<compile_context>
chip_gen: v5e
topology: v5e:2x2
jax: 0.10.0
libtpu: 0.0.40
codegen_flags: <defaults>
</compile_context>

<pallas_src>
import jax
import jax.numpy as jnp
from jax import lax
from jax.experimental import pallas as pl
from jax.experimental.pallas import tpu as pltpu

EPS = 1e-5


# ----------------------------------------------------------------------------
# In-kernel helpers
# ----------------------------------------------------------------------------
def _conv1x1_cm(w, x):
    """1x1 conv in channel-major layout as unrolled VPU FMAs (no MXU).

    w: (C, C) f32 values, indexed (out_ch, in_ch).
    x: (C, T) f32 tile (channels on sublanes, pixels on lanes).
    Returns w @ x of shape (C, T) via C rank-1 broadcast multiply-accumulates.
    """
    c = x.shape[0]
    acc = w[:, 0:1] * x[0:1, :]
    for ci in range(1, c):
        acc = acc + w[:, ci:ci + 1] * x[ci:ci + 1, :]
    return acc


def _stats1_kernel(x_ref, w_ref, sums_ref):
    """Pass 1: accumulate per-channel sum / sum-of-squares of conv1(x)."""
    @pl.when((pl.program_id(0) == 0) & (pl.program_id(1) == 0))
    def _init():
        sums_ref[...] = jnp.zeros_like(sums_ref)

    x = x_ref[0].astype(jnp.float32)                  # (C, T)
    h1 = _conv1x1_cm(w_ref[0], x)                     # bias cancels in BN1
    sums_ref[0] += jnp.sum(h1, axis=-1, keepdims=True)
    sums_ref[1] += jnp.sum(h1 * h1, axis=-1, keepdims=True)


def _stats2_kernel(x_ref, w_ref, ss1_ref, sums_ref):
    """Pass 2: accumulate stats of conv2(relu(bn1(conv1(x))))."""
    @pl.when((pl.program_id(0) == 0) & (pl.program_id(1) == 0))
    def _init():
        sums_ref[...] = jnp.zeros_like(sums_ref)

    x = x_ref[0].astype(jnp.float32)
    h1 = _conv1x1_cm(w_ref[0], x)
    a1 = jnp.maximum(h1 * ss1_ref[0] + ss1_ref[1], 0.0)   # folded BN1 + ReLU
    h2 = _conv1x1_cm(w_ref[1], a1)                         # bias cancels in BN2
    sums_ref[0] += jnp.sum(h2, axis=-1, keepdims=True)
    sums_ref[1] += jnp.sum(h2 * h2, axis=-1, keepdims=True)


def _apply_kernel(x_ref, w_ref, ss1_ref, ss2_ref, o_ref):
    """Pass 3: full forward with folded BNs, residual add, final ReLU."""
    x = x_ref[0].astype(jnp.float32)
    h1 = _conv1x1_cm(w_ref[0], x)
    a1 = jnp.maximum(h1 * ss1_ref[0] + ss1_ref[1], 0.0)
    h2 = _conv1x1_cm(w_ref[1], a1)
    y = h2 * ss2_ref[0] + ss2_ref[1] + x
    o_ref[0] = jnp.maximum(y, 0.0).astype(o_ref.dtype)


# ----------------------------------------------------------------------------
# Wrapper
# ----------------------------------------------------------------------------
def _pick_hw_tile(hw):
    for cand in (2048, 1024, 512, 256, 128):
        if hw % cand == 0:
            return cand
    return hw  # irregular / tiny spatial size: take the full row


def _fold_bn(sums, gamma, beta, m_total):
    """Per-channel (scale, shift) from accumulated sum / sumsq (f32)."""
    mean = sums[0] / m_total                          # (C, 1)
    var = jnp.maximum(sums[1] / m_total - mean * mean, 0.0)
    scale = gamma.reshape(-1, 1) * lax.rsqrt(var + EPS)
    shift = beta.reshape(-1, 1) - mean * scale
    return jnp.stack([scale, shift])                  # (2, C, 1)


@jax.jit
def res_layer_pallas(x_nchw, params):
    """x_nchw: (N, C, H, W) float32.  params: dict of conv/BN parameters."""
    n, c, h, w = x_nchw.shape
    hw = h * w
    m_total = n * hw
    t = _pick_hw_tile(hw)
    grid = (n, hw // t)

    # NCHW -> (N, C, H*W): pure reshape, no HBM transpose round trip.
    x3 = x_nchw.reshape(n, c, hw)

    # Pack both conv weights into one small VMEM operand. Conv biases are
    # omitted: training-mode BN subtracts the batch mean, so they cancel.
    wstack = jnp.stack([params["w1"], params["w2"]]).astype(jnp.float32)

    x_spec = pl.BlockSpec((1, c, t), lambda i, j: (i, 0, j))
    w_spec = pl.BlockSpec((2, c, c), lambda i, j: (0, 0, 0))
    ss_spec = pl.BlockSpec((2, c, 1), lambda i, j: (0, 0, 0))
    sums_spec = pl.BlockSpec((2, c, 1), lambda i, j: (0, 0, 0))
    o_spec = pl.BlockSpec((1, c, t), lambda i, j: (i, 0, j))

    reduce_params = pltpu.CompilerParams(
        dimension_semantics=("arbitrary", "arbitrary"))
    apply_params = pltpu.CompilerParams(
        dimension_semantics=("parallel", "parallel"))

    sums_shape = jax.ShapeDtypeStruct((2, c, 1), jnp.float32)

    # -- pass 1: stats of conv1(x) -> fold BN1 -------------------------------
    sums1 = pl.pallas_call(
        _stats1_kernel, out_shape=sums_shape, grid=grid,
        in_specs=[x_spec, w_spec], out_specs=sums_spec,
        compiler_params=reduce_params,
    )(x3, wstack)
    ss1 = _fold_bn(sums1, params["gamma1"], params["beta1"], m_total)

    # -- pass 2: stats of conv2(relu(bn1(.))) -> fold BN2 ---------------------
    sums2 = pl.pallas_call(
        _stats2_kernel, out_shape=sums_shape, grid=grid,
        in_specs=[x_spec, w_spec, ss_spec], out_specs=sums_spec,
        compiler_params=reduce_params,
    )(x3, wstack, ss1)
    ss2 = _fold_bn(sums2, params["gamma2"], params["beta2"], m_total)

    # -- pass 3: apply everything + residual + final ReLU ---------------------
    out3 = pl.pallas_call(
        _apply_kernel,
        out_shape=jax.ShapeDtypeStruct((n, c, hw), x_nchw.dtype),
        grid=grid,
        in_specs=[x_spec, w_spec, ss_spec, ss_spec], out_specs=o_spec,
        compiler_params=apply_params,
    )(x3, wstack, ss1, ss2)

    return out3.reshape(n, c, h, w)


# ----------------------------------------------------------------------------
# Pure-JAX reference (mirrors the PyTorch module, training-mode BN, with biases)
# ----------------------------------------------------------------------------
def _reference_jax(x_nchw, params):
    n, c, h, w = x_nchw.shape
    x = jnp.transpose(x_nchw, (0, 2, 3, 1)).reshape(-1, c)

    def bn(y, g, b):
        mu = jnp.mean(y, axis=0, keepdims=True)
        var = jnp.mean((y - mu) ** 2, axis=0, keepdims=True)
        return (y - mu) * lax.rsqrt(var + EPS) * g + b

    y = x @ params["w1"].T + params["b1"]
    y = bn(y, params["gamma1"], params["beta1"])
    y = jnp.maximum(y, 0.0)
    y = y @ params["w2"].T + params["b2"]
    y = bn(y, params["gamma2"], params["beta2"])
    y = jnp.maximum(y + x, 0.0)
    return jnp.transpose(y.reshape(n, h, w, c), (0, 3, 1, 2))


def init_params(key, channels):
    """Deterministic synthetic parameters matching PyTorch shapes/defaults."""
    k1, k2, k3, k4 = jax.random.split(key, 4)
    bound = 1.0 / jnp.sqrt(channels)
    return {
        "w1": jax.random.uniform(k1, (channels, channels), jnp.float32, -bound, bound),
        "b1": jax.random.uniform(k2, (channels,), jnp.float32, -bound, bound),
        "gamma1": jnp.ones((channels,), jnp.float32),
        "beta1": jnp.zeros((channels,), jnp.float32),
        "w2": jax.random.uniform(k3, (channels, channels), jnp.float32, -bound, bound),
        "b2": jax.random.uniform(k4, (channels,), jnp.float32, -bound, bound),
        "gamma2": jnp.ones((channels,), jnp.float32),
        "beta2": jnp.zeros((channels,), jnp.float32),
    }


if __name__ == "__main__":
    key = jax.random.PRNGKey(0)
    k_x, k_p = jax.random.split(key)

    N, C, H, W = 2, 4, 16, 16
    x = jax.random.normal(k_x, (N, C, H, W), dtype=jnp.float32)
    params = init_params(k_p, C)

    out = jax.block_until_ready(res_layer_pallas(x, params))
    ref = jax.block_until_ready(_reference_jax(x, params))

    assert out.shape == (N, C, H, W)
    assert jnp.allclose(out, ref, atol=1e-3, rtol=1e-3), "mismatch vs reference"

    print("KERNEL_OK")
</pallas_src>

<mosaic_0001>
module attributes {stable_mosaic.version = 11 : i64} {
  func.func @_stats1_kernel(%arg0: i32, %arg1: i32, %arg2: memref<1x4x256xf32, #tpu.memory_space<vmem>>, %arg3: memref<2x4x4xf32, #tpu.memory_space<vmem>>, %arg4: memref<2x4x1xf32, #tpu.memory_space<vmem>>) attributes {dimension_semantics = [#tpu.dimension_semantics<arbitrary>, #tpu.dimension_semantics<arbitrary>], iteration_bounds = array<i64: 2, 1>, scalar_prefetch = 0 : i64, scratch_operands = 0 : i64, tpu.core_type = #tpu.core_type<tc>, window_params = [{transform_indices = @transform_0, window_bounds = array<i64: 1, 4, 256>}, {pipeline_mode = #tpu.pipeline_mode<synchronous>, transform_indices = @transform_1, window_bounds = array<i64: 2, 4, 4>}, {pipeline_mode = #tpu.pipeline_mode<synchronous>, transform_indices = @transform_2, window_bounds = array<i64: 2, 4, 1>}]} {
    %c0_i32 = arith.constant 0 : i32
    %0 = arith.cmpi eq, %arg0, %c0_i32 : i32
    %c0_i32_0 = arith.constant 0 : i32
    %1 = arith.cmpi eq, %arg1, %c0_i32_0 : i32
    %2 = arith.andi %0, %1 : i1
    %3 = arith.extui %2 : i1 to i32
    %c0_i32_1 = arith.constant 0 : i32
    %4 = arith.cmpi ne, %3, %c0_i32_1 : i32
    scf.if %4 {
      %cst_19 = arith.constant 0.000000e+00 : f32
      %49 = vector.broadcast %cst_19 : f32 to vector<2x4x1xf32>
      %c0_20 = arith.constant 0 : index
      %c0_21 = arith.constant 0 : index
      %c0_22 = arith.constant 0 : index
      %50 = vector.load %arg4[%c0_20, %c0_21, %c0_22] : memref<2x4x1xf32, #tpu.memory_space<vmem>>, vector<2x4x1xf32>
      tpu.vector_store %arg4[%c0_20, %c0_21, %c0_22], %49 {strides = array<i32>} : memref<2x4x1xf32, #tpu.memory_space<vmem>>, vector<2x4x1xf32>,
    } else {
    }
    %c0 = arith.constant 0 : index
    %c0_2 = arith.constant 0 : index
    %c0_3 = arith.constant 0 : index
    %5 = vector.load %arg2[%c0, %c0_2, %c0_3] : memref<1x4x256xf32, #tpu.memory_space<vmem>>, vector<1x4x256xf32>
    %6 = vector.shape_cast %5 : vector<1x4x256xf32> to vector<4x256xf32>
    %c0_4 = arith.constant 0 : index
    %c0_5 = arith.constant 0 : index
    %c0_6 = arith.constant 0 : index
    %7 = vector.load %arg3[%c0_4, %c0_5, %c0_6] : memref<2x4x4xf32, #tpu.memory_space<vmem>>, vector<1x4x4xf32>
    %8 = vector.shape_cast %7 : vector<1x4x4xf32> to vector<4x4xf32>
    %9 = vector.extract_strided_slice %8 {offsets = [0, 0], sizes = [4, 1], strides = [1, 1]} : vector<4x4xf32> to vector<4x1xf32>
    %10 = vector.extract_strided_slice %6 {offsets = [0, 0], sizes = [1, 256], strides = [1, 1]} : vector<4x256xf32> to vector<1x256xf32>
    %11 = vector.broadcast %9 : vector<4x1xf32> to vector<4x256xf32>
    %12 = vector.broadcast %10 : vector<1x256xf32> to vector<4x256xf32>
    %13 = arith.mulf %11, %12 : vector<4x256xf32>
    %14 = vector.extract_strided_slice %8 {offsets = [0, 1], sizes = [4, 1], strides = [1, 1]} : vector<4x4xf32> to vector<4x1xf32>
    %15 = vector.extract_strided_slice %6 {offsets = [1, 0], sizes = [1, 256], strides = [1, 1]} : vector<4x256xf32> to vector<1x256xf32>
    %16 = vector.broadcast %14 : vector<4x1xf32> to vector<4x256xf32>
    %17 = vector.broadcast %15 : vector<1x256xf32> to vector<4x256xf32>
    %18 = arith.mulf %16, %17 : vector<4x256xf32>
    %19 = arith.addf %13, %18 : vector<4x256xf32>
    %20 = vector.extract_strided_slice %8 {offsets = [0, 2], sizes = [4, 1], strides = [1, 1]} : vector<4x4xf32> to vector<4x1xf32>
    %21 = vector.extract_strided_slice %6 {offsets = [2, 0], sizes = [1, 256], strides = [1, 1]} : vector<4x256xf32> to vector<1x256xf32>
    %22 = vector.broadcast %20 : vector<4x1xf32> to vector<4x256xf32>
    %23 = vector.broadcast %21 : vector<1x256xf32> to vector<4x256xf32>
    %24 = arith.mulf %22, %23 : vector<4x256xf32>
    %25 = arith.addf %19, %24 : vector<4x256xf32>
    %26 = vector.extract_strided_slice %8 {offsets = [0, 3], sizes = [4, 1], strides = [1, 1]} : vector<4x4xf32> to vector<4x1xf32>
    %27 = vector.extract_strided_slice %6 {offsets = [3, 0], sizes = [1, 256], strides = [1, 1]} : vector<4x256xf32> to vector<1x256xf32>
    %28 = vector.broadcast %26 : vector<4x1xf32> to vector<4x256xf32>
    %29 = vector.broadcast %27 : vector<1x256xf32> to vector<4x256xf32>
    %30 = arith.mulf %28, %29 : vector<4x256xf32>
    %31 = arith.addf %25, %30 : vector<4x256xf32>
    %c0_7 = arith.constant 0 : index
    %c0_8 = arith.constant 0 : index
    %c0_9 = arith.constant 0 : index
    %32 = vector.load %arg4[%c0_7, %c0_8, %c0_9] : memref<2x4x1xf32, #tpu.memory_space<vmem>>, vector<1x4x1xf32>
    %33 = vector.shape_cast %32 : vector<1x4x1xf32> to vector<4x1xf32>
    %cst = arith.constant dense<0.000000e+00> : vector<4xf32>
    %34 = vector.multi_reduction <add>, %31, %cst [1] : vector<4x256xf32> to vector<4xf32>
    %35 = vector.shape_cast %34 : vector<4xf32> to vector<4x1xf32>
    %36 = arith.addf %33, %35 : vector<4x1xf32>
    %c0_10 = arith.constant 0 : index
    %c0_11 = arith.constant 0 : index
    %c0_12 = arith.constant 0 : index
    %37 = vector.load %arg4[%c0_10, %c0_11, %c0_12] : memref<2x4x1xf32, #tpu.memory_space<vmem>>, vector<1x4x1xf32>
    %38 = vector.shape_cast %37 : vector<1x4x1xf32> to vector<4x1xf32>
    %39 = vector.shape_cast %36 : vector<4x1xf32> to vector<1x4x1xf32>
    tpu.vector_store %arg4[%c0_10, %c0_11, %c0_12], %39 {strides = array<i32>} : memref<2x4x1xf32, #tpu.memory_space<vmem>>, vector<1x4x1xf32>,
    %c1 = arith.constant 1 : index
    %c0_13 = arith.constant 0 : index
    %c0_14 = arith.constant 0 : index
    %40 = vector.load %arg4[%c1, %c0_13, %c0_14] : memref<2x4x1xf32, #tpu.memory_space<vmem>>, vector<1x4x1xf32>
    %41 = vector.shape_cast %40 : vector<1x4x1xf32> to vector<4x1xf32>
    %42 = arith.mulf %31, %31 : vector<4x256xf32>
    %cst_15 = arith.constant dense<0.000000e+00> : vector<4xf32>
    %43 = vector.multi_reduction <add>, %42, %cst_15 [1] : vector<4x256xf32> to vector<4xf32>
    %44 = vector.shape_cast %43 : vector<4xf32> to vector<4x1xf32>
    %45 = arith.addf %41, %44 : vector<4x1xf32>
    %c1_16 = arith.constant 1 : index
    %c0_17 = arith.constant 0 : index
    %c0_18 = arith.constant 0 : index
    %46 = vector.load %arg4[%c1_16, %c0_17, %c0_18] : memref<2x4x1xf32, #tpu.memory_space<vmem>>, vector<1x4x1xf32>
    %47 = vector.shape_cast %46 : vector<1x4x1xf32> to vector<4x1xf32>
    %48 = vector.shape_cast %45 : vector<4x1xf32> to vector<1x4x1xf32>
    tpu.vector_store %arg4[%c1_16, %c0_17, %c0_18], %48 {strides = array<i32>} : memref<2x4x1xf32, #tpu.memory_space<vmem>>, vector<1x4x1xf32>,
    return
  }
  func.func @transform_0(%arg0: i32, %arg1: i32) -> (i32, i32, i32) {
    %c0_i32 = arith.constant 0 : i32
    %c0_i32_0 = arith.constant 0 : i32
    return %arg0, %c0_i32, %arg1 : i32, i32, i32
  }
  func.func @transform_1(%arg0: i32, %arg1: i32) -> (i32, i32, i32) {
    %c0_i32 = arith.constant 0 : i32
    %c0_i32_0 = arith.constant 0 : i32
    %c0_i32_1 = arith.constant 0 : i32
    %c0_i32_2 = arith.constant 0 : i32
    return %c0_i32, %c0_i32_0, %c0_i32_1 : i32, i32, i32
  }
  func.func @transform_2(%arg0: i32, %arg1: i32) -> (i32, i32, i32) {
    %c0_i32 = arith.constant 0 : i32
    %c0_i32_0 = arith.constant 0 : i32
    %c0_i32_1 = arith.constant 0 : i32
    %c0_i32_2 = arith.constant 0 : i32
    return %c0_i32, %c0_i32_0, %c0_i32_1 : i32, i32, i32
  }
}

module attributes {stable_mosaic.version = 11 : i64} {
  func.func @_stats2_kernel(%arg0: i32, %arg1: i32, %arg2: memref<1x4x256xf32, #tpu.memory_space<vmem>>, %arg3: memref<2x4x4xf32, #tpu.memory_space<vmem>>, %arg4: memref<2x4x1xf32, #tpu.memory_space<vmem>>, %arg5: memref<2x4x1xf32, #tpu.memory_space<vmem>>) attributes {dimension_semantics = [#tpu.dimension_semantics<arbitrary>, #tpu.dimension_semantics<arbitrary>], iteration_bounds = array<i64: 2, 1>, scalar_prefetch = 0 : i64, scratch_operands = 0 : i64, tpu.core_type = #tpu.core_type<tc>, window_params = [{transform_indices = @transform_0, window_bounds = array<i64: 1, 4, 256>}, {pipeline_mode = #tpu.pipeline_mode<synchronous>, transform_indices = @transform_1, window_bounds = array<i64: 2, 4, 4>}, {pipeline_mode = #tpu.pipeline_mode<synchronous>, transform_indices = @transform_2, window_bounds = array<i64: 2, 4, 1>}, {pipeline_mode = #tpu.pipeline_mode<synchronous>, transform_indices = @transform_3, window_bounds = array<i64: 2, 4, 1>}]} {
    %c0_i32 = arith.constant 0 : i32
    %0 = arith.cmpi eq, %arg0, %c0_i32 : i32
    %c0_i32_0 = arith.constant 0 : i32
    %1 = arith.cmpi eq, %arg1, %c0_i32_0 : i32
    %2 = arith.andi %0, %1 : i1
    %3 = arith.extui %2 : i1 to i32
    %c0_i32_1 = arith.constant 0 : i32
    %4 = arith.cmpi ne, %3, %c0_i32_1 : i32
    scf.if %4 {
      %cst_29 = arith.constant 0.000000e+00 : f32
      %84 = vector.broadcast %cst_29 : f32 to vector<2x4x1xf32>
      %c0_30 = arith.constant 0 : index
      %c0_31 = arith.constant 0 : index
      %c0_32 = arith.constant 0 : index
      %85 = vector.load %arg5[%c0_30, %c0_31, %c0_32] : memref<2x4x1xf32, #tpu.memory_space<vmem>>, vector<2x4x1xf32>
      tpu.vector_store %arg5[%c0_30, %c0_31, %c0_32], %84 {strides = array<i32>} : memref<2x4x1xf32, #tpu.memory_space<vmem>>, vector<2x4x1xf32>,
    } else {
    }
    %c0 = arith.constant 0 : index
    %c0_2 = arith.constant 0 : index
    %c0_3 = arith.constant 0 : index
    %5 = vector.load %arg2[%c0, %c0_2, %c0_3] : memref<1x4x256xf32, #tpu.memory_space<vmem>>, vector<1x4x256xf32>
    %6 = vector.shape_cast %5 : vector<1x4x256xf32> to vector<4x256xf32>
    %c0_4 = arith.constant 0 : index
    %c0_5 = arith.constant 0 : index
    %c0_6 = arith.constant 0 : index
    %7 = vector.load %arg3[%c0_4, %c0_5, %c0_6] : memref<2x4x4xf32, #tpu.memory_space<vmem>>, vector<1x4x4xf32>
    %8 = vector.shape_cast %7 : vector<1x4x4xf32> to vector<4x4xf32>
    %9 = vector.extract_strided_slice %8 {offsets = [0, 0], sizes = [4, 1], strides = [1, 1]} : vector<4x4xf32> to vector<4x1xf32>
    %10 = vector.extract_strided_slice %6 {offsets = [0, 0], sizes = [1, 256], strides = [1, 1]} : vector<4x256xf32> to vector<1x256xf32>
    %11 = vector.broadcast %9 : vector<4x1xf32> to vector<4x256xf32>
    %12 = vector.broadcast %10 : vector<1x256xf32> to vector<4x256xf32>
    %13 = arith.mulf %11, %12 : vector<4x256xf32>
    %14 = vector.extract_strided_slice %8 {offsets = [0, 1], sizes = [4, 1], strides = [1, 1]} : vector<4x4xf32> to vector<4x1xf32>
    %15 = vector.extract_strided_slice %6 {offsets = [1, 0], sizes = [1, 256], strides = [1, 1]} : vector<4x256xf32> to vector<1x256xf32>
    %16 = vector.broadcast %14 : vector<4x1xf32> to vector<4x256xf32>
    %17 = vector.broadcast %15 : vector<1x256xf32> to vector<4x256xf32>
    %18 = arith.mulf %16, %17 : vector<4x256xf32>
    %19 = arith.addf %13, %18 : vector<4x256xf32>
    %20 = vector.extract_strided_slice %8 {offsets = [0, 2], sizes = [4, 1], strides = [1, 1]} : vector<4x4xf32> to vector<4x1xf32>
    %21 = vector.extract_strided_slice %6 {offsets = [2, 0], sizes = [1, 256], strides = [1, 1]} : vector<4x256xf32> to vector<1x256xf32>
    %22 = vector.broadcast %20 : vector<4x1xf32> to vector<4x256xf32>
    %23 = vector.broadcast %21 : vector<1x256xf32> to vector<4x256xf32>
    %24 = arith.mulf %22, %23 : vector<4x256xf32>
    %25 = arith.addf %19, %24 : vector<4x256xf32>
    %26 = vector.extract_strided_slice %8 {offsets = [0, 3], sizes = [4, 1], strides = [1, 1]} : vector<4x4xf32> to vector<4x1xf32>
    %27 = vector.extract_strided_slice %6 {offsets = [3, 0], sizes = [1, 256], strides = [1, 1]} : vector<4x256xf32> to vector<1x256xf32>
    %28 = vector.broadcast %26 : vector<4x1xf32> to vector<4x256xf32>
    %29 = vector.broadcast %27 : vector<1x256xf32> to vector<4x256xf32>
    %30 = arith.mulf %28, %29 : vector<4x256xf32>
    %31 = arith.addf %25, %30 : vector<4x256xf32>
    %c0_7 = arith.constant 0 : index
    %c0_8 = arith.constant 0 : index
    %c0_9 = arith.constant 0 : index
    %32 = vector.load %arg4[%c0_7, %c0_8, %c0_9] : memref<2x4x1xf32, #tpu.memory_space<vmem>>, vector<1x4x1xf32>
    %33 = vector.shape_cast %32 : vector<1x4x1xf32> to vector<4x1xf32>
    %34 = vector.broadcast %33 : vector<4x1xf32> to vector<4x256xf32>
    %35 = arith.mulf %31, %34 : vector<4x256xf32>
    %c1 = arith.constant 1 : index
    %c0_10 = arith.constant 0 : index
    %c0_11 = arith.constant 0 : index
    %36 = vector.load %arg4[%c1, %c0_10, %c0_11] : memref<2x4x1xf32, #tpu.memory_space<vmem>>, vector<1x4x1xf32>
    %37 = vector.shape_cast %36 : vector<1x4x1xf32> to vector<4x1xf32>
    %38 = vector.broadcast %37 : vector<4x1xf32> to vector<4x256xf32>
    %39 = arith.addf %35, %38 : vector<4x256xf32>
    %cst = arith.constant 0.000000e+00 : f32
    %40 = vector.broadcast %cst : f32 to vector<4x256xf32>
    %41 = arith.maximumf %39, %40 : vector<4x256xf32>
    %c1_12 = arith.constant 1 : index
    %c0_13 = arith.constant 0 : index
    %c0_14 = arith.constant 0 : index
    %42 = vector.load %arg3[%c1_12, %c0_13, %c0_14] : memref<2x4x4xf32, #tpu.memory_space<vmem>>, vector<1x4x4xf32>
    %43 = vector.shape_cast %42 : vector<1x4x4xf32> to vector<4x4xf32>
    %44 = vector.extract_strided_slice %43 {offsets = [0, 0], sizes = [4, 1], strides = [1, 1]} : vector<4x4xf32> to vector<4x1xf32>
    %45 = vector.extract_strided_slice %41 {offsets = [0, 0], sizes = [1, 256], strides = [1, 1]} : vector<4x256xf32> to vector<1x256xf32>
    %46 = vector.broadcast %44 : vector<4x1xf32> to vector<4x256xf32>
    %47 = vector.broadcast %45 : vector<1x256xf32> to vector<4x256xf32>
    %48 = arith.mulf %46, %47 : vector<4x256xf32>
    %49 = vector.extract_strided_slice %43 {offsets = [0, 1], sizes = [4, 1], strides = [1, 1]} : vector<4x4xf32> to vector<4x1xf32>
    %50 = vector.extract_strided_slice %41 {offsets = [1, 0], sizes = [1, 256], strides = [1, 1]} : vector<4x256xf32> to vector<1x256xf32>
    %51 = vector.broadcast %49 : vector<4x1xf32> to vector<4x256xf32>
    %52 = vector.broadcast %50 : vector<1x256xf32> to vector<4x256xf32>
    %53 = arith.mulf %51, %52 : vector<4x256xf32>
    %54 = arith.addf %48, %53 : vector<4x256xf32>
    %55 = vector.extract_strided_slice %43 {offsets = [0, 2], sizes = [4, 1], strides = [1, 1]} : vector<4x4xf32> to vector<4x1xf32>
    %56 = vector.extract_strided_slice %41 {offsets = [2, 0], sizes = [1, 256], strides = [1, 1]} : vector<4x256xf32> to vector<1x256xf32>
    %57 = vector.broadcast %55 : vector<4x1xf32> to vector<4x256xf32>
    %58 = vector.broadcast %56 : vector<1x256xf32> to vector<4x256xf32>
    %59 = arith.mulf %57, %58 : vector<4x256xf32>
    %60 = arith.addf %54, %59 : vector<4x256xf32>
    %61 = vector.extract_strided_slice %43 {offsets = [0, 3], sizes = [4, 1], strides = [1, 1]} : vector<4x4xf32> to vector<4x1xf32>
    %62 = vector.extract_strided_slice %41 {offsets = [3, 0], sizes = [1, 256], strides = [1, 1]} : vector<4x256xf32> to vector<1x256xf32>
    %63 = vector.broadcast %61 : vector<4x1xf32> to vector<4x256xf32>
    %64 = vector.broadcast %62 : vector<1x256xf32> to vector<4x256xf32>
    %65 = arith.mulf %63, %64 : vector<4x256xf32>
    %66 = arith.addf %60, %65 : vector<4x256xf32>
    %c0_15 = arith.constant 0 : index
    %c0_16 = arith.constant 0 : index
    %c0_17 = arith.constant 0 : index
    %67 = vector.load %arg5[%c0_15, %c0_16, %c0_17] : memref<2x4x1xf32, #tpu.memory_space<vmem>>, vector<1x4x1xf32>
    %68 = vector.shape_cast %67 : vector<1x4x1xf32> to vector<4x1xf32>
    %cst_18 = arith.constant dense<0.000000e+00> : vector<4xf32>
    %69 = vector.multi_reduction <add>, %66, %cst_18 [1] : vector<4x256xf32> to vector<4xf32>
    %70 = vector.shape_cast %69 : vector<4xf32> to vector<4x1xf32>
    %71 = arith.addf %68, %70 : vector<4x1xf32>
    %c0_19 = arith.constant 0 : index
    %c0_20 = arith.constant 0 : index
    %c0_21 = arith.constant 0 : index
    %72 = vector.load %arg5[%c0_19, %c0_20, %c0_21] : memref<2x4x1xf32, #tpu.memory_space<vmem>>, vector<1x4x1xf32>
    %73 = vector.shape_cast %72 : vector<1x4x1xf32> to vector<4x1xf32>
    %74 = vector.shape_cast %71 : vector<4x1xf32> to vector<1x4x1xf32>
    tpu.vector_store %arg5[%c0_19, %c0_20, %c0_21], %74 {strides = array<i32>} : memref<2x4x1xf32, #tpu.memory_space<vmem>>, vector<1x4x1xf32>,
    %c1_22 = arith.constant 1 : index
    %c0_23 = arith.constant 0 : index
    %c0_24 = arith.constant 0 : index
    %75 = vector.load %arg5[%c1_22, %c0_23, %c0_24] : memref<2x4x1xf32, #tpu.memory_space<vmem>>, vector<1x4x1xf32>
    %76 = vector.shape_cast %75 : vector<1x4x1xf32> to vector<4x1xf32>
    %77 = arith.mulf %66, %66 : vector<4x256xf32>
    %cst_25 = arith.constant dense<0.000000e+00> : vector<4xf32>
    %78 = vector.multi_reduction <add>, %77, %cst_25 [1] : vector<4x256xf32> to vector<4xf32>
    %79 = vector.shape_cast %78 : vector<4xf32> to vector<4x1xf32>
    %80 = arith.addf %76, %79 : vector<4x1xf32>
    %c1_26 = arith.constant 1 : index
    %c0_27 = arith.constant 0 : index
    %c0_28 = arith.constant 0 : index
    %81 = vector.load %arg5[%c1_26, %c0_27, %c0_28] : memref<2x4x1xf32, #tpu.memory_space<vmem>>, vector<1x4x1xf32>
    %82 = vector.shape_cast %81 : vector<1x4x1xf32> to vector<4x1xf32>
    %83 = vector.shape_cast %80 : vector<4x1xf32> to vector<1x4x1xf32>
    tpu.vector_store %arg5[%c1_26, %c0_27, %c0_28], %83 {strides = array<i32>} : memref<2x4x1xf32, #tpu.memory_space<vmem>>, vector<1x4x1xf32>,
    return
  }
  func.func @transform_0(%arg0: i32, %arg1: i32) -> (i32, i32, i32) {
    %c0_i32 = arith.constant 0 : i32
    %c0_i32_0 = arith.constant 0 : i32
    return %arg0, %c0_i32, %arg1 : i32, i32, i32
  }
  func.func @transform_1(%arg0: i32, %arg1: i32) -> (i32, i32, i32) {
    %c0_i32 = arith.constant 0 : i32
    %c0_i32_0 = arith.constant 0 : i32
    %c0_i32_1 = arith.constant 0 : i32
    %c0_i32_2 = arith.constant 0 : i32
    return %c0_i32, %c0_i32_0, %c0_i32_1 : i32, i32, i32
  }
  func.func @transform_2(%arg0: i32, %arg1: i32) -> (i32, i32, i32) {
    %c0_i32 = arith.constant 0 : i32
    %c0_i32_0 = arith.constant 0 : i32
    %c0_i32_1 = arith.constant 0 : i32
    %c0_i32_2 = arith.constant 0 : i32
    return %c0_i32, %c0_i32_0, %c0_i32_1 : i32, i32, i32
  }
  func.func @transform_3(%arg0: i32, %arg1: i32) -> (i32, i32, i32) {
    %c0_i32 = arith.constant 0 : i32
    %c0_i32_0 = arith.constant 0 : i32
    %c0_i32_1 = arith.constant 0 : i32
    %c0_i32_2 = arith.constant 0 : i32
    return %c0_i32, %c0_i32_0, %c0_i32_1 : i32, i32, i32
  }
}

module attributes {stable_mosaic.version = 11 : i64} {
  func.func @_apply_kernel(%arg0: i32, %arg1: i32, %arg2: memref<1x4x256xf32, #tpu.memory_space<vmem>>, %arg3: memref<2x4x4xf32, #tpu.memory_space<vmem>>, %arg4: memref<2x4x1xf32, #tpu.memory_space<vmem>>, %arg5: memref<2x4x1xf32, #tpu.memory_space<vmem>>, %arg6: memref<1x4x256xf32, #tpu.memory_space<vmem>>) attributes {dimension_semantics = [#tpu.dimension_semantics<parallel>, #tpu.dimension_semantics<parallel>], iteration_bounds = array<i64: 2, 1>, scalar_prefetch = 0 : i64, scratch_operands = 0 : i64, tpu.core_type = #tpu.core_type<tc>, window_params = [{transform_indices = @transform_0, window_bounds = array<i64: 1, 4, 256>}, {pipeline_mode = #tpu.pipeline_mode<synchronous>, transform_indices = @transform_1, window_bounds = array<i64: 2, 4, 4>}, {pipeline_mode = #tpu.pipeline_mode<synchronous>, transform_indices = @transform_2, window_bounds = array<i64: 2, 4, 1>}, {pipeline_mode = #tpu.pipeline_mode<synchronous>, transform_indices = @transform_3, window_bounds = array<i64: 2, 4, 1>}, {transform_indices = @transform_4, window_bounds = array<i64: 1, 4, 256>}]} {
    %c0 = arith.constant 0 : index
    %c0_0 = arith.constant 0 : index
    %c0_1 = arith.constant 0 : index
    %0 = vector.load %arg2[%c0, %c0_0, %c0_1] : memref<1x4x256xf32, #tpu.memory_space<vmem>>, vector<1x4x256xf32>
    %1 = vector.shape_cast %0 : vector<1x4x256xf32> to vector<4x256xf32>
    %c0_2 = arith.constant 0 : index
    %c0_3 = arith.constant 0 : index
    %c0_4 = arith.constant 0 : index
    %2 = vector.load %arg3[%c0_2, %c0_3, %c0_4] : memref<2x4x4xf32, #tpu.memory_space<vmem>>, vector<1x4x4xf32>
    %3 = vector.shape_cast %2 : vector<1x4x4xf32> to vector<4x4xf32>
    %4 = vector.extract_strided_slice %3 {offsets = [0, 0], sizes = [4, 1], strides = [1, 1]} : vector<4x4xf32> to vector<4x1xf32>
    %5 = vector.extract_strided_slice %1 {offsets = [0, 0], sizes = [1, 256], strides = [1, 1]} : vector<4x256xf32> to vector<1x256xf32>
    %6 = vector.broadcast %4 : vector<4x1xf32> to vector<4x256xf32>
    %7 = vector.broadcast %5 : vector<1x256xf32> to vector<4x256xf32>
    %8 = arith.mulf %6, %7 : vector<4x256xf32>
    %9 = vector.extract_strided_slice %3 {offsets = [0, 1], sizes = [4, 1], strides = [1, 1]} : vector<4x4xf32> to vector<4x1xf32>
    %10 = vector.extract_strided_slice %1 {offsets = [1, 0], sizes = [1, 256], strides = [1, 1]} : vector<4x256xf32> to vector<1x256xf32>
    %11 = vector.broadcast %9 : vector<4x1xf32> to vector<4x256xf32>
    %12 = vector.broadcast %10 : vector<1x256xf32> to vector<4x256xf32>
    %13 = arith.mulf %11, %12 : vector<4x256xf32>
    %14 = arith.addf %8, %13 : vector<4x256xf32>
    %15 = vector.extract_strided_slice %3 {offsets = [0, 2], sizes = [4, 1], strides = [1, 1]} : vector<4x4xf32> to vector<4x1xf32>
    %16 = vector.extract_strided_slice %1 {offsets = [2, 0], sizes = [1, 256], strides = [1, 1]} : vector<4x256xf32> to vector<1x256xf32>
    %17 = vector.broadcast %15 : vector<4x1xf32> to vector<4x256xf32>
    %18 = vector.broadcast %16 : vector<1x256xf32> to vector<4x256xf32>
    %19 = arith.mulf %17, %18 : vector<4x256xf32>
    %20 = arith.addf %14, %19 : vector<4x256xf32>
    %21 = vector.extract_strided_slice %3 {offsets = [0, 3], sizes = [4, 1], strides = [1, 1]} : vector<4x4xf32> to vector<4x1xf32>
    %22 = vector.extract_strided_slice %1 {offsets = [3, 0], sizes = [1, 256], strides = [1, 1]} : vector<4x256xf32> to vector<1x256xf32>
    %23 = vector.broadcast %21 : vector<4x1xf32> to vector<4x256xf32>
    %24 = vector.broadcast %22 : vector<1x256xf32> to vector<4x256xf32>
    %25 = arith.mulf %23, %24 : vector<4x256xf32>
    %26 = arith.addf %20, %25 : vector<4x256xf32>
    %c0_5 = arith.constant 0 : index
    %c0_6 = arith.constant 0 : index
    %c0_7 = arith.constant 0 : index
    %27 = vector.load %arg4[%c0_5, %c0_6, %c0_7] : memref<2x4x1xf32, #tpu.memory_space<vmem>>, vector<1x4x1xf32>
    %28 = vector.shape_cast %27 : vector<1x4x1xf32> to vector<4x1xf32>
    %29 = vector.broadcast %28 : vector<4x1xf32> to vector<4x256xf32>
    %30 = arith.mulf %26, %29 : vector<4x256xf32>
    %c1 = arith.constant 1 : index
    %c0_8 = arith.constant 0 : index
    %c0_9 = arith.constant 0 : index
    %31 = vector.load %arg4[%c1, %c0_8, %c0_9] : memref<2x4x1xf32, #tpu.memory_space<vmem>>, vector<1x4x1xf32>
    %32 = vector.shape_cast %31 : vector<1x4x1xf32> to vector<4x1xf32>
    %33 = vector.broadcast %32 : vector<4x1xf32> to vector<4x256xf32>
    %34 = arith.addf %30, %33 : vector<4x256xf32>
    %cst = arith.constant 0.000000e+00 : f32
    %35 = vector.broadcast %cst : f32 to vector<4x256xf32>
    %36 = arith.maximumf %34, %35 : vector<4x256xf32>
    %c1_10 = arith.constant 1 : index
    %c0_11 = arith.constant 0 : index
    %c0_12 = arith.constant 0 : index
    %37 = vector.load %arg3[%c1_10, %c0_11, %c0_12] : memref<2x4x4xf32, #tpu.memory_space<vmem>>, vector<1x4x4xf32>
    %38 = vector.shape_cast %37 : vector<1x4x4xf32> to vector<4x4xf32>
    %39 = vector.extract_strided_slice %38 {offsets = [0, 0], sizes = [4, 1], strides = [1, 1]} : vector<4x4xf32> to vector<4x1xf32>
    %40 = vector.extract_strided_slice %36 {offsets = [0, 0], sizes = [1, 256], strides = [1, 1]} : vector<4x256xf32> to vector<1x256xf32>
    %41 = vector.broadcast %39 : vector<4x1xf32> to vector<4x256xf32>
    %42 = vector.broadcast %40 : vector<1x256xf32> to vector<4x256xf32>
    %43 = arith.mulf %41, %42 : vector<4x256xf32>
    %44 = vector.extract_strided_slice %38 {offsets = [0, 1], sizes = [4, 1], strides = [1, 1]} : vector<4x4xf32> to vector<4x1xf32>
    %45 = vector.extract_strided_slice %36 {offsets = [1, 0], sizes = [1, 256], strides = [1, 1]} : vector<4x256xf32> to vector<1x256xf32>
    %46 = vector.broadcast %44 : vector<4x1xf32> to vector<4x256xf32>
    %47 = vector.broadcast %45 : vector<1x256xf32> to vector<4x256xf32>
    %48 = arith.mulf %46, %47 : vector<4x256xf32>
    %49 = arith.addf %43, %48 : vector<4x256xf32>
    %50 = vector.extract_strided_slice %38 {offsets = [0, 2], sizes = [4, 1], strides = [1, 1]} : vector<4x4xf32> to vector<4x1xf32>
    %51 = vector.extract_strided_slice %36 {offsets = [2, 0], sizes = [1, 256], strides = [1, 1]} : vector<4x256xf32> to vector<1x256xf32>
    %52 = vector.broadcast %50 : vector<4x1xf32> to vector<4x256xf32>
    %53 = vector.broadcast %51 : vector<1x256xf32> to vector<4x256xf32>
    %54 = arith.mulf %52, %53 : vector<4x256xf32>
    %55 = arith.addf %49, %54 : vector<4x256xf32>
    %56 = vector.extract_strided_slice %38 {offsets = [0, 3], sizes = [4, 1], strides = [1, 1]} : vector<4x4xf32> to vector<4x1xf32>
    %57 = vector.extract_strided_slice %36 {offsets = [3, 0], sizes = [1, 256], strides = [1, 1]} : vector<4x256xf32> to vector<1x256xf32>
    %58 = vector.broadcast %56 : vector<4x1xf32> to vector<4x256xf32>
    %59 = vector.broadcast %57 : vector<1x256xf32> to vector<4x256xf32>
    %60 = arith.mulf %58, %59 : vector<4x256xf32>
    %61 = arith.addf %55, %60 : vector<4x256xf32>
    %c0_13 = arith.constant 0 : index
    %c0_14 = arith.constant 0 : index
    %c0_15 = arith.constant 0 : index
    %62 = vector.load %arg5[%c0_13, %c0_14, %c0_15] : memref<2x4x1xf32, #tpu.memory_space<vmem>>, vector<1x4x1xf32>
    %63 = vector.shape_cast %62 : vector<1x4x1xf32> to vector<4x1xf32>
    %64 = vector.broadcast %63 : vector<4x1xf32> to vector<4x256xf32>
    %65 = arith.mulf %61, %64 : vector<4x256xf32>
    %c1_16 = arith.constant 1 : index
    %c0_17 = arith.constant 0 : index
    %c0_18 = arith.constant 0 : index
    %66 = vector.load %arg5[%c1_16, %c0_17, %c0_18] : memref<2x4x1xf32, #tpu.memory_space<vmem>>, vector<1x4x1xf32>
    %67 = vector.shape_cast %66 : vector<1x4x1xf32> to vector<4x1xf32>
    %68 = vector.broadcast %67 : vector<4x1xf32> to vector<4x256xf32>
    %69 = arith.addf %65, %68 : vector<4x256xf32>
    %70 = arith.addf %69, %1 : vector<4x256xf32>
    %cst_19 = arith.constant 0.000000e+00 : f32
    %71 = vector.broadcast %cst_19 : f32 to vector<4x256xf32>
    %72 = arith.maximumf %70, %71 : vector<4x256xf32>
    %c0_20 = arith.constant 0 : index
    %c0_21 = arith.constant 0 : index
    %c0_22 = arith.constant 0 : index
    %73 = vector.load %arg6[%c0_20, %c0_21, %c0_22] : memref<1x4x256xf32, #tpu.memory_space<vmem>>, vector<1x4x256xf32>
    %74 = vector.shape_cast %73 : vector<1x4x256xf32> to vector<4x256xf32>
    %75 = vector.shape_cast %72 : vector<4x256xf32> to vector<1x4x256xf32>
    tpu.vector_store %arg6[%c0_20, %c0_21, %c0_22], %75 {strides = array<i32>} : memref<1x4x256xf32, #tpu.memory_space<vmem>>, vector<1x4x256xf32>,
    return
  }
  func.func @transform_0(%arg0: i32, %arg1: i32) -> (i32, i32, i32) {
    %c0_i32 = arith.constant 0 : i32
    %c0_i32_0 = arith.constant 0 : i32
    return %arg0, %c0_i32, %arg1 : i32, i32, i32
  }
  func.func @transform_1(%arg0: i32, %arg1: i32) -> (i32, i32, i32) {
    %c0_i32 = arith.constant 0 : i32
    %c0_i32_0 = arith.constant 0 : i32
    %c0_i32_1 = arith.constant 0 : i32
    %c0_i32_2 = arith.constant 0 : i32
    return %c0_i32, %c0_i32_0, %c0_i32_1 : i32, i32, i32
  }
  func.func @transform_2(%arg0: i32, %arg1: i32) -> (i32, i32, i32) {
    %c0_i32 = arith.constant 0 : i32
    %c0_i32_0 = arith.constant 0 : i32
    %c0_i32_1 = arith.constant 0 : i32
    %c0_i32_2 = arith.constant 0 : i32
    return %c0_i32, %c0_i32_0, %c0_i32_1 : i32, i32, i32
  }
  func.func @transform_3(%arg0: i32, %arg1: i32) -> (i32, i32, i32) {
    %c0_i32 = arith.constant 0 : i32
    %c0_i32_0 = arith.constant 0 : i32
    %c0_i32_1 = arith.constant 0 : i32
    %c0_i32_2 = arith.constant 0 : i32
    return %c0_i32, %c0_i32_0, %c0_i32_1 : i32, i32, i32
  }
  func.func @transform_4(%arg0: i32, %arg1: i32) -> (i32, i32, i32) {
    %c0_i32 = arith.constant 0 : i32
    %c0_i32_0 = arith.constant 0 : i32
    return %arg0, %c0_i32, %arg1 : i32, i32, i32
  }
}

</mosaic_0001>

<bundles_post_ra>
// kernel: res_layer_pallas.3
= control target key start
LH: loop header
LB: loop body
LE: loop exit
PB: predicated region body
PF: predicated region fallthrough
CT: control target
= control target key end

     0   :  { %s378_s9 = smov 0   ;;  %s380_s10 = smov 0   ;;  %s429_s0 = inlined_call_operand.vmem [shape: f32[2,4,256], index: 0, kind: input, shape index: {}]   ;;  %s430_s1 = inlined_call_operand.vmem [shape: f32[2,4,4], index: 1, kind: input, shape index: {}]   ;;  %s431_s2 = inlined_call_operand.vmem [shape: f32[2,4,1], index: 2, kind: output, shape index: {}]  }
   0x1   :  { %s382_s11 = smov 0  }
   0x2 LB: > { %s24_s12 = sadd.s32 1, %s352_s10  ;;  %p290_p0 = scmp.ge.s32.totalorder %s356_s11, 1  ;;  %s356_s11 = sphi %s382_s11, %s12_s11   ;;  %s352_s10 = sphi %s380_s10, %s433_s10   ;;  %s348_s9 = sphi %s378_s9, %s432_s9  }
   0x3   : > { %p26_p1 = scmp.ge.s32.totalorder %s24_s12, 2  ;;  %p126_p2 = scmp.lt.s32.totalorder %s356_s11, 3 }
   0x5   : > { %s435_s12 = smov (%p26_p1, %s24_s12), 0  ;;  %p127_p3 = pnand %p290_p0, %p126_p2 }
   0x6   : > { %p148_p4 = scmp.lt.s32.totalorder (!%p127_p3), %s348_s9, 1  ;;  %p157_p5 = scmp.eq.s32.totalorder (!%p127_p3), %s348_s9, 0 }
   0x7   : > { %130 = sbr.rel (%p127_p3) target bundleno = 281 (0x119), region = 28 }
   0xc   : > { %s437_s9 = smov (!%p148_p4, %s348_s9), 1  ;;  %162 = sbr.rel (!%p157_p5) target bundleno = 17 (0x11), region = 32  ;;  %vm163_vm0 = vcmask (%p157_p5), 3072   ;;  %v358_v0 = vmov (%p157_p5), 0.0  }
   0xd   : > { %s298_s13 = sshll.u32 %s437_s9, 3  ;;  %164 = vst.msk [vmem:[%s431_s2] sm:$0xf] (%p157_p5), %vm163_vm0, %v358_v0 }
   0xe   : > { %s155_s16 = scalar_lea.vmem %s429_s0, %s298_s13  ;;  %165 = vst.msk [vmem:[%s431_s2 + $0x4] sm:$0xf] (%p157_p5), %vm163_vm0, %v358_v0 }
  0x11 PF: > { %v167_v1 = vld [vmem:[%s430_s1] sm:$0xf]  ;;  %v359_v2 = vmov 0   ;;  %v360_v3 = vmov 2   ;;  %v361_v4 = vmov 1   ;;  %v362_v5 = vmov 3  }
  0x12   : > { %329 = vset.pattern.permute.xlu0 %v359_v2  ;;  %331 = vset.pattern.permute.xlu1 %v360_v3  ;;  %v166_v6 = vld [vmem:[%s155_s16] sm:$0xff]  ;;  %vm225_vm1 = vcmask 1043456   ;;  %vm232_vm2 = vcmask 3072  }
  0x13   : > { %170 = vperm.xlu0 %329, %v167_v1   ;;  %197 = vperm.xlu1 %331, %v167_v1   ;;  %v174_v9 = vperm.slane %v166_v6, 0  ;;  %v175_v10 = vperm.slane %v166_v6, 4  ;;  %v186_v11 = vperm.slane %v166_v6, 1  ;;  %v187_v12 = vperm.slane %v166_v6, 5 }
  0x14   : > { %v200_v13 = vperm.slane %v166_v6, 2  ;;  %v201_v14 = vperm.slane %v166_v6, 6  ;;  %v214_v15 = vperm.slane %v166_v6, 3  ;;  %v215_v16 = vperm.slane %v166_v6, 7  ;;  %v224_v49 = vld [vmem:[%s431_s2] sm:$0xf] }
  0x15   : > { %v178_v17 = vperm.slane %v174_v9, 0  ;;  %v179_v18 = vperm.slane %v175_v10, 0  ;;  %v190_v19 = vperm.slane %v186_v11, 1  ;;  %v191_v20 = vperm.slane %v187_v12, 1  ;;  %v294_v52 = vld [vmem:[%s431_s2 + $0x4] sm:$0xf] }
  0x16   : > { %v204_v21 = vperm.slane %v200_v13, 2  ;;  %v205_v22 = vperm.slane %v201_v14, 2  ;;  %v218_v23 = vperm.slane %v214_v15, 3  ;;  %v219_v24 = vperm.slane %v215_v16, 3 }
  0x1b   : > { %330 = vset.pattern.permute.xlu0 %v361_v4  ;;  %332 = vset.pattern.permute.xlu1 %v362_v5 }
  0x1c   : > { %183 = vperm.xlu0 %330, %v167_v1   ;;  %211 = vperm.xlu1 %332, %v167_v1  }
  0x24   : > { %333 = vset.pattern.permute.xlu0 %v362_v5 }
  0x85   : > { %v171_v7 = vpop.permute.xlu0 %170  ;;  %v198_v8 = vpop.permute.xlu1 %197 }
  0x86   : > { %v180_v27 = vmul.f32 %v178_v17, %v171_v7  ;;  %v181_v28 = vmul.f32 %v179_v18, %v171_v7  ;;  %v206_v31 = vmul.f32 %v204_v21, %v198_v8  ;;  %v207_v32 = vmul.f32 %v205_v22, %v198_v8 }
  0x8e   : > { %v184_v25 = vpop.permute.xlu0 %183  ;;  %v212_v26 = vpop.permute.xlu1 %211 }
  0x8f   : > { %v192_v29 = vmul.f32 %v190_v19, %v184_v25  ;;  %v193_v30 = vmul.f32 %v191_v20, %v184_v25  ;;  %v220_v35 = vmul.f32 %v218_v23, %v212_v26  ;;  %v221_v36 = vmul.f32 %v219_v24, %v212_v26 }
  0x91   : > { %v194_v33 = vadd.f32 %v192_v29, %v180_v27  ;;  %v195_v34 = vadd.f32 %v193_v30, %v181_v28 }
  0x93   : > { %v208_v37 = vadd.f32 %v206_v31, %v194_v33  ;;  %v209_v38 = vadd.f32 %v207_v32, %v195_v34 }
  0x95   : > { %v222_v39 = vadd.f32 %v220_v35, %v208_v37  ;;  %v223_v40 = vadd.f32 %v221_v36, %v209_v38 }
  0x97   : > { %v226_v41 = vsel %vm225_vm1, %v222_v39, 0.0  ;;  %v227_v42 = vsel %vm225_vm1, %v223_v40, 0.0  ;;  %v236_v44 = vmul.f32 %v222_v39, %v222_v39  ;;  %v237_v45 = vmul.f32 %v223_v40, %v223_v40 }
  0x98   : > { %v228_v43 = vadd.f32 %v227_v42, %v226_v41 }
  0x99   : > { %v238_v46 = vsel %vm225_vm1, %v236_v44, 0.0  ;;  %v239_v47 = vsel %vm225_vm1, %v237_v45, 0.0 }
  0x9a   : > { %229 = vadd.xlane.f32.xlu2 %v228_v43  ;;  %v240_v48 = vadd.f32 %v239_v47, %v238_v46 }
  0xa2   : > { %241 = vadd.xlane.f32.xlu2 %v240_v48 }
 0x10d   : > { %v230_v50 = vpop.xlane.xlu2 %229 }
 0x10e   : > { %v231_v51 = vadd.f32 %v230_v50, %v224_v49 }
 0x110   : > { %233 = vst.msk [vmem:[%s431_s2] sm:$0xf] %vm232_vm2, %v231_v51 }
 0x115   : > { %v242_v53 = vpop.xlane.xlu2 %241 }
 0x116   : > { %v243_v54 = vadd.f32 %v294_v52, %v242_v53 }
 0x118   : > { %295 = vst.msk [vmem:[%s431_s2 + $0x4] sm:$0xf] %vm232_vm2, %v243_v54 }
 0x119 PF: > { %s12_s11 = sadd.s32 1, %s356_s11   ;;  %s432_s9 = smov %s352_s10 }
 0x11a   : > { %p9_p6 = scmp.ge.s32.totalorder %s12_s11, 4   ;;  %s433_s10 = smov %s435_s12 }
 0x11c   :  { %11 = sbr.rel (!%p9_p6) target bundleno = 2 (0x2), region = 59 }

// kernel: res_layer_pallas.4
= control target key start
LH: loop header
LB: loop body
LE: loop exit
PB: predicated region body
PF: predicated region fallthrough
CT: control target
= control target key end

     0   :  { %s477_s12 = smov 0   ;;  %s479_s13 = smov 0   ;;  %s540_s0 = inlined_call_operand.vmem [shape: f32[2,4,256], index: 0, kind: input, shape index: {}]   ;;  %s541_s1 = inlined_call_operand.vmem [shape: f32[2,4,4], index: 1, kind: input, shape index: {}]   ;;  %s542_s2 = inlined_call_operand.vmem [shape: f32[2,4,1], index: 2, kind: input, shape index: {}]   ;;  %s543_s3 = inlined_call_operand.vmem [shape: f32[2,4,1], index: 3, kind: output, shape index: {}]  }
   0x1   :  { %s481_s14 = smov 0  }
   0x2 LB: > { %s25_s15 = sadd.s32 1, %s446_s13  ;;  %p377_p0 = scmp.ge.s32.totalorder %s450_s14, 1  ;;  %s450_s14 = sphi %s481_s14, %s13_s14   ;;  %s446_s13 = sphi %s479_s13, %s545_s13   ;;  %s442_s12 = sphi %s477_s12, %s544_s12  }
   0x3   : > { %p27_p1 = scmp.ge.s32.totalorder %s25_s15, 2  ;;  %p151_p2 = scmp.lt.s32.totalorder %s450_s14, 3 }
   0x5   : > { %s547_s15 = smov (%p27_p1, %s25_s15), 0  ;;  %p152_p3 = pnand %p377_p0, %p151_p2 }
   0x6   : > { %p175_p4 = scmp.lt.s32.totalorder (!%p152_p3), %s442_s12, 1  ;;  %p184_p5 = scmp.eq.s32.totalorder (!%p152_p3), %s442_s12, 0 }
   0x7   : > { %155 = sbr.rel (%p152_p3) target bundleno = 291 (0x123), region = 32 }
   0xc   : > { %s549_s12 = smov (!%p175_p4, %s442_s12), 1  ;;  %189 = sbr.rel (!%p184_p5) target bundleno = 17 (0x11), region = 36  ;;  %vm190_vm0 = vcmask (%p184_p5), 3072   ;;  %v452_v0 = vmov (%p184_p5), 0.0  }
   0xd   : > { %s387_s16 = sshll.u32 %s549_s12, 3  ;;  %191 = vst.msk [vmem:[%s543_s3] sm:$0xf] (%p184_p5), %vm190_vm0, %v452_v0 }
   0xe   : > { %s498_s19 = scalar_lea.vmem %s540_s0, %s387_s16  ;;  %192 = vst.msk [vmem:[%s543_s3 + $0x4] sm:$0xf] (%p184_p5), %vm190_vm0, %v452_v0 }
  0x11 PF: > { %v194_v1 = vld [vmem:[%s541_s1] sm:$0xf]  ;;  %v453_v2 = vmov 2   ;;  %v454_v3 = vmov 0   ;;  %v381_v5 = vld [vmem:[%s542_s2 + $0x4] sm:$0xf] }
  0x12   : > { %420 = vset.pattern.permute.xlu1 %v453_v2  ;;  %418 = vset.pattern.permute.xlu0 %v454_v3  ;;  %v251_v4 = vld [vmem:[%s542_s2] sm:$0xf]  ;;  %v455_v6 = vmov 3   ;;  %v456_v7 = vmov 1   ;;  %v382_v8 = vld [vmem:[%s541_s1 + $0x4] sm:$0xf] }
  0x13   : > { %224 = vperm.xlu1 %420, %v194_v1   ;;  %197 = vperm.xlu0 %418, %v194_v1   ;;  %v193_v9 = vld [vmem:[%s498_s19] sm:$0xff]  ;;  %vm312_vm1 = vcmask 1043456   ;;  %vm319_vm2 = vcmask 3072  }
  0x14   : > { %422 = vset.pattern.permute.xlu2 %v454_v3  ;;  %v201_v12 = vperm.slane %v193_v9, 0  ;;  %v202_v13 = vperm.slane %v193_v9, 4  ;;  %v213_v14 = vperm.slane %v193_v9, 1  ;;  %v214_v15 = vperm.slane %v193_v9, 5 }
  0x15   : > { %254 = vperm.xlu2 %422, %v251_v4   ;;  %v227_v16 = vperm.slane %v193_v9, 2  ;;  %v228_v17 = vperm.slane %v193_v9, 6  ;;  %v241_v19 = vperm.slane %v193_v9, 3  ;;  %v242_v20 = vperm.slane %v193_v9, 7 }
  0x16   : > { %v205_v21 = vperm.slane %v201_v12, 0  ;;  %v206_v22 = vperm.slane %v202_v13, 0  ;;  %v217_v23 = vperm.slane %v213_v14, 1  ;;  %v218_v24 = vperm.slane %v214_v15, 1 }
  0x17   : > { %v231_v25 = vperm.slane %v227_v16, 2  ;;  %v232_v26 = vperm.slane %v228_v17, 2  ;;  %v245_v29 = vperm.slane %v241_v19, 3  ;;  %v246_v30 = vperm.slane %v242_v20, 3 }
  0x1b   : > { %421 = vset.pattern.permute.xlu1 %v455_v6  ;;  %419 = vset.pattern.permute.xlu0 %v456_v7 }
  0x1c   : > { %238 = vperm.xlu1 %421, %v194_v1   ;;  %210 = vperm.xlu0 %419, %v194_v1  }
  0x1d   : > { %263 = vperm.xlu2 %422, %v381_v5  }
  0x24   : > { %423 = vset.pattern.permute.xlu1 %v454_v3  ;;  %425 = vset.pattern.permute.xlu0 %v453_v2 }
  0x25   : > { %274 = vperm.xlu1 %423, %v382_v8   ;;  %292 = vperm.xlu0 %425, %v382_v8  }
  0x26   : > { %424 = vset.pattern.permute.xlu2 %v456_v7 }
  0x27   : > { %282 = vperm.xlu2 %424, %v382_v8  }
  0x2d   : > { %426 = vset.pattern.permute.xlu1 %v455_v6  ;;  %427 = vset.pattern.permute.xlu0 %v455_v6 }
  0x2e   : > { %302 = vperm.xlu1 %426, %v382_v8  }
  0x6f   : > { %v255_v18 = vpop.permute.xlu2 %254 }
  0x77   : > { %v264_v43 = vpop.permute.xlu2 %263 }
  0x81   : > { %v283_v53 = vpop.permute.xlu2 %282 }
  0x85   : > { %v198_v10 = vpop.permute.xlu0 %197  ;;  %v225_v11 = vpop.permute.xlu1 %224 }
  0x86   : > { %v207_v31 = vmul.f32 %v205_v21, %v198_v10  ;;  %v208_v32 = vmul.f32 %v206_v22, %v198_v10  ;;  %v233_v35 = vmul.f32 %v231_v25, %v225_v11  ;;  %v234_v36 = vmul.f32 %v232_v26, %v225_v11  ;;  %v311_v22 = vld [vmem:[%s543_s3] sm:$0xf] }
  0x8e   : > { %v211_v27 = vpop.permute.xlu0 %210  ;;  %v239_v28 = vpop.permute.xlu1 %238 }
  0x8f   : > { %v219_v33 = vmul.f32 %v217_v23, %v211_v27  ;;  %v220_v34 = vmul.f32 %v218_v24, %v211_v27  ;;  %v247_v41 = vmul.f32 %v245_v29, %v239_v28  ;;  %v248_v42 = vmul.f32 %v246_v30, %v239_v28  ;;  %v383_v24 = vld [vmem:[%s543_s3 + $0x4] sm:$0xf] }
  0x91   : > { %v221_v37 = vadd.f32 %v219_v33, %v207_v31  ;;  %v222_v38 = vadd.f32 %v220_v34, %v208_v32 }
  0x93   : > { %v235_v39 = vadd.f32 %v233_v35, %v221_v37  ;;  %v236_v40 = vadd.f32 %v234_v36, %v222_v38 }
  0x95   : > { %v249_v44 = vadd.f32 %v247_v41, %v235_v39  ;;  %v250_v45 = vadd.f32 %v248_v42, %v236_v40 }
  0x97   : > { %v257_v46 = vmul.f32 %v255_v18, %v249_v44  ;;  %v258_v47 = vmul.f32 %v255_v18, %v250_v45  ;;  %v275_v48 = vpop.permute.xlu1 %274  ;;  %v293_v58 = vpop.permute.xlu0 %292 }
  0x99   : > { %v266_v49 = vadd.f32 %v264_v43, %v257_v46  ;;  %v267_v50 = vadd.f32 %v264_v43, %v258_v47 }
  0x9b   : > { %v268_v51 = vmax.f32 %v266_v49, 0.0  ;;  %v269_v52 = vmax.f32 %v267_v50, 0.0 }
  0x9d   : > { %v277_v54 = vperm.slane %v268_v51, 0  ;;  %v278_v55 = vperm.slane %v269_v52, 0  ;;  %v285_v56 = vperm.slane %v268_v51, 1  ;;  %v286_v57 = vperm.slane %v269_v52, 1 }
  0x9e   : > { %v295_v59 = vperm.slane %v268_v51, 2  ;;  %v296_v60 = vperm.slane %v269_v52, 2  ;;  %v305_v2 = vperm.slane %v268_v51, 3  ;;  %v306_v3 = vperm.slane %v269_v52, 3 }
  0x9f   : > { %v279_v61 = vmul.f32 %v277_v54, %v275_v48  ;;  %v280_v62 = vmul.f32 %v278_v55, %v275_v48  ;;  %v287_v63 = vmul.f32 %v285_v56, %v283_v53  ;;  %v288_v0 = vmul.f32 %v286_v57, %v283_v53 }
  0xa0   : > { %v303_v1 = vpop.permute.xlu1 %302  ;;  %v297_v6 = vmul.f32 %v295_v59, %v293_v58  ;;  %v298_v7 = vmul.f32 %v296_v60, %v293_v58 }
  0xa1   : > { %v289_v4 = vadd.f32 %v287_v63, %v279_v61  ;;  %v290_v5 = vadd.f32 %v288_v0, %v280_v62  ;;  %v307_v10 = vmul.f32 %v305_v2, %v303_v1  ;;  %v308_v11 = vmul.f32 %v306_v3, %v303_v1 }
  0xa3   : > { %v299_v8 = vadd.f32 %v297_v6, %v289_v4  ;;  %v300_v9 = vadd.f32 %v298_v7, %v290_v5 }
  0xa5   : > { %v309_v12 = vadd.f32 %v307_v10, %v299_v8  ;;  %v310_v13 = vadd.f32 %v308_v11, %v300_v9 }
  0xa7   : > { %v313_v14 = vsel %vm312_vm1, %v309_v12, 0.0  ;;  %v314_v15 = vsel %vm312_vm1, %v310_v13, 0.0  ;;  %v323_v16 = vmul.f32 %v309_v12, %v309_v12  ;;  %v324_v17 = vmul.f32 %v310_v13, %v310_v13 }
  0xa8   : > { %v315_v18 = vadd.f32 %v314_v15, %v313_v14 }
  0xa9   : > { %v325_v19 = vsel %vm312_vm1, %v323_v16, 0.0  ;;  %v326_v20 = vsel %vm312_vm1, %v324_v17, 0.0 }
  0xaa   : > { %316 = vadd.xlane.f32.xlu2 %v315_v18  ;;  %v327_v21 = vadd.f32 %v326_v20, %v325_v19 }
  0xac   : > { %328 = vadd.xlane.f32.xlu1 %v327_v21 }
 0x11d   : > { %v317_v23 = vpop.xlane.xlu2 %316 }
 0x11e   : > { %v318_v25 = vadd.f32 %v317_v23, %v311_v22 }
 0x11f   : > { %v329_v26 = vpop.xlane.xlu1 %328 }
 0x120   : > { %320 = vst.msk [vmem:[%s543_s3] sm:$0xf] %vm319_vm2, %v318_v25  ;;  %v330_v27 = vadd.f32 %v383_v24, %v329_v26 }
 0x122   : > { %384 = vst.msk [vmem:[%s543_s3 + $0x4] sm:$0xf] %vm319_vm2, %v330_v27 }
 0x123 PF: > { %s13_s14 = sadd.s32 1, %s450_s14   ;;  %s544_s12 = smov %s446_s13 }
 0x124   : > { %p10_p6 = scmp.ge.s32.totalorder %s13_s14, 4   ;;  %s545_s13 = smov %s547_s15 }
 0x126   :  { %12 = sbr.rel (!%p10_p6) target bundleno = 2 (0x2), region = 65 }

// kernel: res_layer_pallas.5
= control target key start
LH: loop header
LB: loop body
LE: loop exit
PB: predicated region body
PF: predicated region fallthrough
CT: control target
= control target key end

     0   :  { %s584_s15 = smov 0   ;;  %s586_s16 = smov 0   ;;  %s646_s0 = inlined_call_operand.vmem [shape: f32[2,4,256], index: 0, kind: input, shape index: {}]   ;;  %s647_s1 = inlined_call_operand.vmem [shape: f32[2,4,4], index: 1, kind: input, shape index: {}]   ;;  %s648_s2 = inlined_call_operand.vmem [shape: f32[2,4,1], index: 2, kind: input, shape index: {}]   ;;  %s649_s3 = inlined_call_operand.vmem [shape: f32[2,4,1], index: 3, kind: input, shape index: {}]   ;;  %s650_s4 = inlined_call_operand.vmem [shape: f32[2,4,256], index: 4, kind: output, shape index: {}]  }
   0x1   :  { %s588_s17 = smov 0  }
   0x2 LB: > { %s26_s18 = sadd.s32 1, %s549_s16  ;;  %p479_p0 = scmp.ge.s32.totalorder %s553_s17, 1  ;;  %s553_s17 = sphi %s588_s17, %s14_s17   ;;  %s549_s16 = sphi %s586_s16, %s652_s16   ;;  %s545_s15 = sphi %s584_s15, %s651_s15  }
   0x3   : > { %p28_p1 = scmp.ge.s32.totalorder %s26_s18, 2  ;;  %p183_p2 = scmp.lt.s32.totalorder %s553_s17, 3 }
   0x5   : > { %s654_s18 = smov (%p28_p1, %s26_s18), 0  ;;  %p184_p3 = pnand %p479_p0, %p183_p2 }
   0x6   : > { %p218_p4 = scmp.lt.s32.totalorder (!%p184_p3), %s545_s15, 1 }
   0x7   : > { %187 = sbr.rel (%p184_p3) target bundleno = 175 (0xaf), region = 36 }
   0xc   : > { %v238_v0 = vld [vmem:[%s647_s1] sm:$0xf]  ;;  %v555_v1 = vmov 2   ;;  %v556_v2 = vmov 0   ;;  %v484_v4 = vld [vmem:[%s648_s2 + $0x4] sm:$0xf] }
   0xd   : > { %521 = vset.pattern.permute.xlu1 %v555_v1  ;;  %519 = vset.pattern.permute.xlu0 %v556_v2  ;;  %v295_v3 = vld [vmem:[%s648_s2] sm:$0xf]  ;;  %v557_v5 = vmov 3   ;;  %v558_v6 = vmov 1   ;;  %v485_v7 = vld [vmem:[%s647_s1 + $0x4] sm:$0xf] }
   0xe   : > { %268 = vperm.xlu1 %521, %v238_v0   ;;  %241 = vperm.xlu0 %519, %v238_v0   ;;  %v355_v8 = vld [vmem:[%s649_s3] sm:$0xf]  ;;  %v486_v9 = vld [vmem:[%s649_s3 + $0x4] sm:$0xf]  ;;  %s656_s15 = smov (!%p218_p4, %s545_s15), 1  ;;  %vm384_vm0 = vcmask 1043456  }
   0xf   : > { %523 = vset.pattern.permute.xlu2 %v556_v2  ;;  %s489_s5 = sshll.u32 %s656_s15, 3 }
  0x10   : > { %298 = vperm.xlu2 %523, %v295_v3   ;;  %s225_s8 = scalar_lea.vmem %s646_s0, %s489_s5  ;;  %s235_s11 = scalar_lea.vmem %s650_s4, %s489_s5 }
  0x11   : > { %v237_v10 = vld [vmem:[%s225_s8] sm:$0xff] }
  0x12   : > { %372 = vst [vmem:[#allocation1] ss:$2 sm:$0xff] %v237_v10  ;;  %v245_v13 = vperm.slane %v237_v10, 0  ;;  %v246_v14 = vperm.slane %v237_v10, 4  ;;  %v257_v15 = vperm.slane %v237_v10, 1  ;;  %v258_v16 = vperm.slane %v237_v10, 5 }
  0x13   : > { %v271_v18 = vperm.slane %v237_v10, 2  ;;  %v272_v19 = vperm.slane %v237_v10, 6  ;;  %v285_v20 = vperm.slane %v237_v10, 3  ;;  %v286_v21 = vperm.slane %v237_v10, 7 }
  0x14   : > { %v249_v22 = vperm.slane %v245_v13, 0  ;;  %v250_v23 = vperm.slane %v246_v14, 0  ;;  %v261_v24 = vperm.slane %v257_v15, 1  ;;  %v262_v25 = vperm.slane %v258_v16, 1 }
  0x15   : > { %v275_v26 = vperm.slane %v271_v18, 2  ;;  %v276_v27 = vperm.slane %v272_v19, 2  ;;  %v289_v29 = vperm.slane %v285_v20, 3  ;;  %v290_v30 = vperm.slane %v286_v21, 3 }
  0x16   : > { %522 = vset.pattern.permute.xlu1 %v557_v5  ;;  %520 = vset.pattern.permute.xlu0 %v558_v6 }
  0x17   : > { %282 = vperm.xlu1 %522, %v238_v0   ;;  %254 = vperm.xlu0 %520, %v238_v0  }
  0x18   : > { %307 = vperm.xlu2 %523, %v484_v4  }
  0x19   : > { %v373_v19 = vld.sshfl [vmem:[#allocation1] sm:$0xff pattern:$0x75316420]  ;;  %v374_v20 = vld.sshfl [vmem:[#allocation1 + $0x8] sm:$0xff pattern:$0x75316420] }
  0x1f   : > { %524 = vset.pattern.permute.xlu1 %v556_v2  ;;  %526 = vset.pattern.permute.xlu0 %v555_v1 }
  0x20   : > { %318 = vperm.xlu1 %524, %v485_v7   ;;  %336 = vperm.xlu0 %526, %v485_v7  }
  0x21   : > { %525 = vset.pattern.permute.xlu2 %v558_v6 }
  0x22   : > { %326 = vperm.xlu2 %525, %v485_v7  }
  0x28   : > { %527 = vset.pattern.permute.xlu1 %v557_v5  ;;  %530 = vset.pattern.permute.xlu0 %v556_v2 }
  0x29   : > { %346 = vperm.xlu1 %527, %v485_v7  }
  0x2a   : > { %528 = vset.pattern.permute.xlu2 %v556_v2 }
  0x2b   : > { %358 = vperm.xlu2 %528, %v355_v8  }
  0x31   : > { %529 = vset.pattern.permute.xlu1 %v556_v2 }
  0x32   : > { %367 = vperm.xlu1 %529, %v486_v9  }
  0x6a   : > { %v299_v17 = vpop.permute.xlu2 %298 }
  0x72   : > { %v308_v40 = vpop.permute.xlu2 %307 }
  0x7c   : > { %v327_v52 = vpop.permute.xlu2 %326 }
  0x80   : > { %v269_v11 = vpop.permute.xlu1 %268  ;;  %v242_v12 = vpop.permute.xlu0 %241 }
  0x81   : > { %v251_v32 = vmul.f32 %v249_v22, %v242_v12  ;;  %v252_v33 = vmul.f32 %v250_v23, %v242_v12  ;;  %v277_v36 = vmul.f32 %v275_v26, %v269_v11  ;;  %v278_v37 = vmul.f32 %v276_v27, %v269_v11 }
  0x85   : > { %v359_v13 = vpop.permute.xlu2 %358 }
  0x89   : > { %v283_v28 = vpop.permute.xlu1 %282  ;;  %v255_v31 = vpop.permute.xlu0 %254 }
  0x8a   : > { %v263_v34 = vmul.f32 %v261_v24, %v255_v31  ;;  %v264_v35 = vmul.f32 %v262_v25, %v255_v31  ;;  %v291_v41 = vmul.f32 %v289_v29, %v283_v28  ;;  %v292_v42 = vmul.f32 %v290_v30, %v283_v28 }
  0x8c   : > { %v265_v38 = vadd.f32 %v263_v34, %v251_v32  ;;  %v266_v39 = vadd.f32 %v264_v35, %v252_v33 }
  0x8e   : > { %v279_v43 = vadd.f32 %v277_v36, %v265_v38  ;;  %v280_v44 = vadd.f32 %v278_v37, %v266_v39 }
  0x90   : > { %v293_v45 = vadd.f32 %v291_v41, %v279_v43  ;;  %v294_v46 = vadd.f32 %v292_v42, %v280_v44 }
  0x92   : > { %v301_v47 = vmul.f32 %v299_v17, %v293_v45  ;;  %v302_v48 = vmul.f32 %v299_v17, %v294_v46  ;;  %v319_v49 = vpop.permute.xlu1 %318  ;;  %v337_v59 = vpop.permute.xlu0 %336 }
  0x94   : > { %v310_v50 = vadd.f32 %v308_v40, %v301_v47  ;;  %v311_v51 = vadd.f32 %v308_v40, %v302_v48 }
  0x96   : > { %v312_v53 = vmax.f32 %v310_v50, 0.0  ;;  %v313_v54 = vmax.f32 %v311_v51, 0.0 }
  0x98   : > { %v321_v55 = vperm.slane %v312_v53, 0  ;;  %v322_v56 = vperm.slane %v313_v54, 0  ;;  %v329_v57 = vperm.slane %v312_v53, 1  ;;  %v330_v58 = vperm.slane %v313_v54, 1 }
  0x99   : > { %v339_v60 = vperm.slane %v312_v53, 2  ;;  %v340_v61 = vperm.slane %v313_v54, 2  ;;  %v349_v3 = vperm.slane %v312_v53, 3  ;;  %v350_v4 = vperm.slane %v313_v54, 3 }
  0x9a   : > { %v323_v62 = vmul.f32 %v321_v55, %v319_v49  ;;  %v324_v63 = vmul.f32 %v322_v56, %v319_v49  ;;  %v331_v0 = vmul.f32 %v329_v57, %v327_v52  ;;  %v332_v1 = vmul.f32 %v330_v58, %v327_v52 }
  0x9b   : > { %v347_v2 = vpop.permute.xlu1 %346  ;;  %v341_v7 = vmul.f32 %v339_v60, %v337_v59  ;;  %v342_v8 = vmul.f32 %v340_v61, %v337_v59 }
  0x9c   : > { %v333_v5 = vadd.f32 %v331_v0, %v323_v62  ;;  %v334_v6 = vadd.f32 %v332_v1, %v324_v63  ;;  %v351_v11 = vmul.f32 %v349_v3, %v347_v2  ;;  %v352_v12 = vmul.f32 %v350_v4, %v347_v2 }
  0x9e   : > { %v343_v9 = vadd.f32 %v341_v7, %v333_v5  ;;  %v344_v10 = vadd.f32 %v342_v8, %v334_v6 }
  0xa0   : > { %v353_v14 = vadd.f32 %v351_v11, %v343_v9  ;;  %v354_v15 = vadd.f32 %v352_v12, %v344_v10 }
  0xa2   : > { %v361_v16 = vmul.f32 %v359_v13, %v353_v14  ;;  %v362_v17 = vmul.f32 %v359_v13, %v354_v15 }
  0xa4   : > { %v368_v18 = vpop.permute.xlu1 %367 }
  0xa5   : > { %v370_v21 = vadd.f32 %v368_v18, %v361_v16  ;;  %v371_v22 = vadd.f32 %v368_v18, %v362_v17 }
  0xa7   : > { %v377_v23 = vadd.f32 %v373_v19, %v370_v21  ;;  %v378_v24 = vadd.f32 %v374_v20, %v371_v22 }
  0xa9   : > { %v380_v25 = vmax.f32 %v378_v24, 0.0  ;;  %v379_v26 = vmax.f32 %v377_v23, 0.0 }
  0xab   : > { %v383_v27 = vrot.slane %v380_v25, 4 }
  0xad   : > { %v385_v28 = vsel %vm384_vm0, %v379_v26, %v383_v27 }
  0xae   : > { %387 = vst [vmem:[%s235_s11] sm:$0xff] %v385_v28 }
  0xaf PF: > { %s14_s17 = sadd.s32 1, %s553_s17   ;;  %s651_s15 = smov %s549_s16 }
  0xb0   : > { %p11_p5 = scmp.ge.s32.totalorder %s14_s17, 4   ;;  %s652_s16 = smov %s654_s18 }
  0xb2   :  { %13 = sbr.rel (!%p11_p5) target bundleno = 2 (0x2), region = 69 }

</bundles_post_ra>
